<compile_context>
chip_gen: v7x
topology: tpu7x:2x2x1
jax: 0.10.0
libtpu: 0.0.40
codegen_flags: <defaults>
</compile_context>

<pallas_src>
import jax
import jax.numpy as jnp
from jax.experimental import pallas as pl
from jax.experimental.pallas import tpu as pltpu


# -----------------------------------------------------------------------------
# Zero-cost path (recommended): a view is just metadata.
# -----------------------------------------------------------------------------
def unflatten_view(x, N=-1, C=128, H=7, W=7):
    total = x.size
    chw = C * H * W
    n = (total // chw) if N == -1 else N
    assert n * chw == total, "shape mismatch for view"
    return x.reshape(n, C, H, W)


# -----------------------------------------------------------------------------
# HBM -> HBM DMA identity copy (used when the output must be materialized).
# -----------------------------------------------------------------------------
def _make_dma_copy_kernel(n_chunks, chunk_rows):
    """Build a kernel that copies the whole input HBM buffer to the output
    HBM buffer using `n_chunks` non-overlapping row-chunk DMAs."""

    def kernel(x_hbm, o_hbm, sems):
        if n_chunks == 1:
            cp = pltpu.make_async_copy(x_hbm, o_hbm, sems.at[0])
            cp.start()
            cp.wait()
        else:
            # Issue all chunk DMAs first (descriptors overlap on the DMA
            # engines), then wait for all of them.
            copies = []
            for c in range(n_chunks):
                r0 = c * chunk_rows  # static, 8-row aligned
                cp = pltpu.make_async_copy(
                    x_hbm.at[pl.ds(r0, chunk_rows)],
                    o_hbm.at[pl.ds(r0, chunk_rows)],
                    sems.at[c],
                )
                cp.start()
                copies.append(cp)
            for cp in copies:
                cp.wait()

    return kernel


def _choose_chunking(x):
    """Pick a small static chunk count along the leading axis.

    Chunk boundaries are kept 8-row aligned (HBM tile sublane boundary) so
    every chunk DMA is a clean, tile-aligned block copy; otherwise fall back
    to a single whole-buffer DMA (always legal)."""
    if x.ndim < 2:
        return 1, x.shape[0] if x.ndim == 1 else 1
    rows = x.shape[0]
    for cand in (8, 4, 2):
        if rows % cand == 0 and (rows // cand) % 8 == 0:
            return cand, rows // cand
    return 1, rows


def unflatten_pallas(x, N=-1, C=128, H=7, W=7):
    """Equivalent of Unflatten(N, C, H, W).forward(x), materialized via a
    direct HBM->HBM DMA copy.  Element order matches torch .view on a
    contiguous input.  Prefer `unflatten_view` unless a distinct output
    buffer is required."""
    total = x.size
    chw = C * H * W
    n = (total // chw) if N == -1 else N
    assert n * chw == total, "shape mismatch for view"

    n_chunks, chunk_rows = _choose_chunking(x)
    itemsize = jnp.dtype(x.dtype).itemsize

    copied = pl.pallas_call(
        _make_dma_copy_kernel(n_chunks, chunk_rows),
        out_shape=jax.ShapeDtypeStruct(x.shape, x.dtype),
        in_specs=[pl.BlockSpec(memory_space=pl.ANY)],   # raw HBM ref (no auto-DMA)
        out_specs=pl.BlockSpec(memory_space=pl.ANY),    # raw HBM ref
        scratch_shapes=[pltpu.SemaphoreType.DMA((n_chunks,))],
        cost_estimate=pl.CostEstimate(
            flops=0,
            transcendentals=0,
            bytes_accessed=2 * total * itemsize,
        ),
    )(x)

    # Metadata-level reshape to NCHW (same element order as torch .view).
    return copied.reshape(n, C, H, W)


if __name__ == "__main__":
    # Small, module-consistent shapes: batch=2, C=4, H=4, W=8 -> C*H*W = 128
    # (lane-friendly last dim, same structure as the default 128*7*7 = 6272).
    batch, C, H, W = 2, 4, 4, 8
    key = jax.random.PRNGKey(0)
    x = jax.random.normal(key, (batch, C * H * W), dtype=jnp.float32)

    # --- f32 path (single whole-buffer DMA) ---
    out = jax.block_until_ready(unflatten_pallas(x, N=-1, C=C, H=H, W=W))
    ref = x.reshape(batch, C, H, W)
    assert out.shape == (batch, C, H, W), out.shape
    assert out.dtype == x.dtype
    assert bool(jnp.array_equal(out, ref))

    # --- bf16 path (native dtype copy, no packing wrapper) ---
    xb = x.astype(jnp.bfloat16)
    outb = jax.block_until_ready(unflatten_pallas(xb, N=-1, C=C, H=H, W=W))
    assert outb.shape == (batch, C, H, W) and outb.dtype == jnp.bfloat16
    assert bool(jnp.array_equal(outb, xb.reshape(batch, C, H, W)))

    # --- default module config, exercises the chunked-DMA path (rows=32) ---
    x2 = jax.random.normal(jax.random.PRNGKey(1), (32, 128 * 7 * 7),
                           dtype=jnp.float32)
    out2 = jax.block_until_ready(unflatten_pallas(x2))
    assert out2.shape == (32, 128, 7, 7)
    assert bool(jnp.array_equal(out2, x2.reshape(32, 128, 7, 7)))

    # --- zero-copy view path (the recommended production path) ---
    assert bool(jnp.array_equal(unflatten_view(x, -1, C, H, W), ref))

    print("KERNEL_OK")
</pallas_src>

<mosaic_0001>
module attributes {stable_mosaic.version = 11 : i64} {
  func.func @kernel(%arg0: memref<2x128xf32, #tpu.memory_space<any>>, %arg1: memref<2x128xf32, #tpu.memory_space<any>>, %arg2: memref<1x!tpu.dma_semaphore, #tpu.memory_space<semaphore_mem>>) attributes {dimension_semantics = [], scalar_prefetch = 0 : i64, scratch_operands = 1 : i64, tpu.core_type = #tpu.core_type<tc>} {
    %c0_i32 = arith.constant 0 : i32
    %0 = tpu.memref_slice %arg2[%c0_i32] : memref<1x!tpu.dma_semaphore, #tpu.memory_space<semaphore_mem>> -> memref<1x!tpu.dma_semaphore, #tpu.memory_space<semaphore_mem>>
    %1 = tpu.memref_squeeze %0 : memref<1x!tpu.dma_semaphore, #tpu.memory_space<semaphore_mem>> -> memref<!tpu.dma_semaphore, #tpu.memory_space<semaphore_mem>>
    tpu.enqueue_dma source(%arg0 : memref<2x128xf32, #tpu.memory_space<any>>) target(%arg1 : memref<2x128xf32, #tpu.memory_space<any>>) target_semaphore(%1 : memref<!tpu.dma_semaphore, #tpu.memory_space<semaphore_mem>>)
    %c0_i32_0 = arith.constant 0 : i32
    %2 = tpu.memref_slice %arg2[%c0_i32_0] : memref<1x!tpu.dma_semaphore, #tpu.memory_space<semaphore_mem>> -> memref<1x!tpu.dma_semaphore, #tpu.memory_space<semaphore_mem>>
    %3 = tpu.memref_squeeze %2 : memref<1x!tpu.dma_semaphore, #tpu.memory_space<semaphore_mem>> -> memref<!tpu.dma_semaphore, #tpu.memory_space<semaphore_mem>>
    tpu.wait_dma2 semaphore(%3 : memref<!tpu.dma_semaphore, #tpu.memory_space<semaphore_mem>>) src(%arg0 : memref<2x128xf32, #tpu.memory_space<any>>) dst(%arg1 : memref<2x128xf32, #tpu.memory_space<any>>)
    return
  }
}

</mosaic_0001>

<bundles_post_ra>
// kernel: tpu_custom_call.1
= control target key start
LH: loop header
LB: loop body
LE: loop exit
PB: predicated region body
PF: predicated region fallthrough
CT: control target
= control target key end

     0   :  { %s34_s6 = smov [#allocation2]   ;;  %s35_s7 = smov [#allocation3]   ;;  %s53_s0 = inlined_call_operand.hbm [shape: f32[2,128], index: 0, kind: input, shape index: {}]   ;;  %s54_s1 = inlined_call_operand.hbm [shape: f32[2,128], index: 1, kind: output, shape index: {}]  }
   0x1   :  { %s36_s8 = smov 0  }
   0x2   :  { %18 = dma.general %s53_s0, 32, %s54_s1, %s34_s6, %s35_s7, [#allocation4], %s36_s8, 0  }
   0x3   :  { %32 = dma.done.wait [#allocation2], 32 }
   0x4   :  { %33 = vsyncadd [#allocation2], 4294967264 }
   0x5   :  { %22 = vsyncmov [#allocation2] }
   0x8   :  { %s23_s13 = vpop.sfrf %22 }
   0x9   :  { %p28_p0 = scmp.ne.s32.totalorder %s23_s13, 0 }
   0xb   :  { %27 = shalt.err (%p28_p0)  }

</bundles_post_ra>
